<compile_context>
chip_gen: v7x
topology: tpu7x:2x2x1
jax: 0.10.0
libtpu: 0.0.40
codegen_flags: <defaults>
</compile_context>

<pallas_src>
import jax
import jax.numpy as jnp
from jax.experimental import pallas as pl
from jax.experimental.pallas import tpu as pltpu


def _round_up(v, m):
    return (v + m - 1) // m * m


def _make_kernel(n_parts):
    """out = sum_i x_i @ w_i + bias  (all operands already tiled into VMEM)."""

    def kernel(*refs):
        x_refs = refs[:n_parts]
        w_refs = refs[n_parts:2 * n_parts]
        b_ref = refs[2 * n_parts]
        o_ref = refs[2 * n_parts + 1]

        # Partial dot-products: fuses the feature-axis concat into the matmul.
        # Weights are pre-transposed to (d_i, TN) -> plain last/first-dim
        # contraction, MXU-native, no in-kernel transpose.
        acc = jnp.dot(x_refs[0][...], w_refs[0][...],
                      preferred_element_type=jnp.float32)
        for x_r, w_r in zip(x_refs[1:], w_refs[1:]):
            acc = acc + jnp.dot(x_r[...], w_r[...],
                                preferred_element_type=jnp.float32)

        # Bias added once per output tile to the f32 accumulator.
        o_ref[...] = (acc + b_ref[...]).astype(o_ref.dtype)

    return kernel


def conditional_linear(x, s, t, z, weight, bias, sp=None, ep=None,
                       *, tm=512, tn=512):
    """Equivalent of ConditionalLinear.forward.

    x, s, t, z, (sp, ep): (B, d_i) arrays, conceptually concatenated on axis=1.
    weight: (num_out, num_in) -- PyTorch nn.Linear layout.
    bias:   (num_out,)
    """
    parts = (x, s, t, z) if sp is None else (x, s, t, sp, ep, z)
    n_parts = len(parts)
    B = parts[0].shape[0]
    dims = [p.shape[1] for p in parts]
    num_in = sum(dims)
    num_out = weight.shape[0]
    dtype = parts[0].dtype
    itemsize = jnp.dtype(dtype).itemsize

    # ---- one-time weight prep (lane-dense N, pre-transposed, split per part)
    n_pad = _round_up(num_out, 128)
    w_t = weight.T  # (num_in, num_out)
    if n_pad != num_out:
        w_t = jnp.pad(w_t, ((0, 0), (0, n_pad - num_out)))
        bias_p = jnp.pad(bias, (0, n_pad - num_out))
    else:
        bias_p = bias
    bias2d = bias_p.reshape(1, n_pad).astype(dtype)
    w_parts = []
    off = 0
    for d in dims:
        w_parts.append(w_t[off:off + d, :].astype(dtype))
        off += d

    # ---- output-column tiling (multiple of 128, divides n_pad)
    tn_eff = n_pad
    for cand in (tn, 512, 256, 128):
        if cand >= 128 and cand <= n_pad and n_pad % cand == 0:
            tn_eff = cand
            break
    grid_n = n_pad // tn_eff

    # ---- batch tiling (aim for >= 2 row blocks so megacore can shard)
    if B <= 8:
        tm_eff = B              # single block == full dim (always legal)
    else:
        tm_eff = min(tm, _round_up(-(-B // 2), 8))
        tm_eff = max(tm_eff, 8)
    b_pad = _round_up(B, tm_eff)
    if b_pad != B:
        parts_p = tuple(jnp.pad(p, ((0, b_pad - B), (0, 0))) for p in parts)
    else:
        parts_p = parts
    grid_m = b_pad // tm_eff

    # ---- specs (grid = (row_tile i, col_tile j))
    in_specs = (
        [pl.BlockSpec((tm_eff, d), lambda i, j: (i, 0)) for d in dims]      # x_i
        + [pl.BlockSpec((d, tn_eff), lambda i, j: (0, j)) for d in dims]    # w_i
        + [pl.BlockSpec((1, tn_eff), lambda i, j: (0, j))]                  # bias
    )
    out_specs = pl.BlockSpec((tm_eff, tn_eff), lambda i, j: (i, j))

    # ---- VMEM budget (double-buffered blocks; lane/sublane padded estimate)
    act_bytes = 2 * sum(_round_up(tm_eff, 8) * _round_up(d, 128) for d in dims)
    w_bytes = 2 * sum(_round_up(d, 8) * tn_eff for d in dims)
    bias_bytes = 2 * 8 * tn_eff
    out_bytes = 2 * _round_up(tm_eff, 8) * tn_eff
    needed = (act_bytes + w_bytes + bias_bytes + out_bytes) * itemsize
    vmem_limit = int(min(max(2 * needed + (1 << 20), 16 << 20), 48 << 20))

    cost = pl.CostEstimate(
        flops=2 * b_pad * num_in * n_pad,
        transcendentals=0,
        bytes_accessed=itemsize * (b_pad * num_in
                                   + num_in * n_pad * grid_m
                                   + n_pad + b_pad * n_pad),
    )

    out = pl.pallas_call(
        _make_kernel(n_parts),
        out_shape=jax.ShapeDtypeStruct((b_pad, n_pad), dtype),
        grid_spec=pltpu.PrefetchScalarGridSpec(
            num_scalar_prefetch=0,
            grid=(grid_m, grid_n),
            in_specs=in_specs,
            out_specs=out_specs,
        ),
        compiler_params=pltpu.CompilerParams(
            dimension_semantics=("parallel", "parallel"),
            vmem_limit_bytes=vmem_limit,
        ),
        cost_estimate=cost,
    )(*parts_p, *w_parts, bias2d)

    return out[:B, :num_out]


if __name__ == "__main__":
    key = jax.random.PRNGKey(0)
    kx, ks, kt, kz, kw, kb, ksp, kep, kw2, kb2 = jax.random.split(key, 10)

    # small, forward-consistent shapes: batch=8, feature splits 16+4+4+8 = 32
    B = 8
    dx, ds, dt, dz = 16, 4, 4, 8
    num_in = dx + ds + dt + dz   # 32
    num_out = 32

    x = jax.random.normal(kx, (B, dx), dtype=jnp.float32)
    s = jax.random.normal(ks, (B, ds), dtype=jnp.float32)
    t = jax.random.normal(kt, (B, dt), dtype=jnp.float32)
    z = jax.random.normal(kz, (B, dz), dtype=jnp.float32)

    bound = 1.0 / (num_in ** 0.5)
    weight = jax.random.uniform(kw, (num_out, num_in), jnp.float32, -bound, bound)
    bias = jax.random.uniform(kb, (num_out,), jnp.float32, -bound, bound)

    # --- branch 1: (x, s, t, z)
    out = conditional_linear(x, s, t, z, weight, bias)
    out = jax.block_until_ready(out)
    ref = jnp.concatenate((x, s, t, z), axis=1) @ weight.T + bias
    assert out.shape == (B, num_out)
    assert jnp.allclose(out, ref, atol=1e-5, rtol=1e-5)

    # --- branch 2: (x, s, t, sp, ep, z)
    dsp, dep = 4, 4
    num_in2 = num_in + dsp + dep
    sp = jax.random.normal(ksp, (B, dsp), dtype=jnp.float32)
    ep = jax.random.normal(kep, (B, dep), dtype=jnp.float32)
    bound2 = 1.0 / (num_in2 ** 0.5)
    weight2 = jax.random.uniform(kw2, (num_out, num_in2), jnp.float32, -bound2, bound2)
    bias2 = jax.random.uniform(kb2, (num_out,), jnp.float32, -bound2, bound2)

    out2 = conditional_linear(x, s, t, z, weight2, bias2, sp=sp, ep=ep)
    out2 = jax.block_until_ready(out2)
    ref2 = jnp.concatenate((x, s, t, sp, ep, z), axis=1) @ weight2.T + bias2
    assert out2.shape == (B, num_out)
    assert jnp.allclose(out2, ref2, atol=1e-5, rtol=1e-5)

    print("KERNEL_OK")
</pallas_src>

<mosaic_0001>
module attributes {stable_mosaic.version = 11 : i64} {
  func.func @kernel(%arg0: i32, %arg1: i32, %arg2: memref<8x16xf32, #tpu.memory_space<vmem>>, %arg3: memref<8x4xf32, #tpu.memory_space<vmem>>, %arg4: memref<8x4xf32, #tpu.memory_space<vmem>>, %arg5: memref<8x8xf32, #tpu.memory_space<vmem>>, %arg6: memref<16x128xf32, #tpu.memory_space<vmem>>, %arg7: memref<4x128xf32, #tpu.memory_space<vmem>>, %arg8: memref<4x128xf32, #tpu.memory_space<vmem>>, %arg9: memref<8x128xf32, #tpu.memory_space<vmem>>, %arg10: memref<1x128xf32, #tpu.memory_space<vmem>>, %arg11: memref<8x128xf32, #tpu.memory_space<vmem>>) attributes {dimension_semantics = [#tpu.dimension_semantics<parallel>, #tpu.dimension_semantics<parallel>], iteration_bounds = array<i64: 1, 1>, scalar_prefetch = 0 : i64, scratch_operands = 0 : i64, tpu.core_type = #tpu.core_type<tc>, window_params = [{transform_indices = @transform_0, window_bounds = array<i64: 8, 16>}, {transform_indices = @transform_1, window_bounds = array<i64: 8, 4>}, {transform_indices = @transform_2, window_bounds = array<i64: 8, 4>}, {transform_indices = @transform_3, window_bounds = array<i64: 8, 8>}, {transform_indices = @transform_4, window_bounds = array<i64: 16, 128>}, {transform_indices = @transform_5, window_bounds = array<i64: 4, 128>}, {transform_indices = @transform_6, window_bounds = array<i64: 4, 128>}, {transform_indices = @transform_7, window_bounds = array<i64: 8, 128>}, {transform_indices = @transform_8, window_bounds = array<i64: 1, 128>}, {transform_indices = @transform_9, window_bounds = array<i64: 8, 128>}]} {
    %c0 = arith.constant 0 : index
    %c0_0 = arith.constant 0 : index
    %0 = vector.load %arg2[%c0, %c0_0] : memref<8x16xf32, #tpu.memory_space<vmem>>, vector<8x16xf32>
    %c0_1 = arith.constant 0 : index
    %c0_2 = arith.constant 0 : index
    %1 = vector.load %arg6[%c0_1, %c0_2] : memref<16x128xf32, #tpu.memory_space<vmem>>, vector<16x128xf32>
    %cst = arith.constant dense<0.000000e+00> : vector<8x128xf32>
    %2 = tpu.matmul %0, %1, %cst {dimension_numbers = #tpu.dot_dimension_numbers<[1], [0], [0], [1], [0, 0, 1, 1], [], []>} : vector<8x16xf32>, vector<16x128xf32>, vector<8x128xf32> -> vector<8x128xf32>
    %c0_3 = arith.constant 0 : index
    %c0_4 = arith.constant 0 : index
    %3 = vector.load %arg3[%c0_3, %c0_4] : memref<8x4xf32, #tpu.memory_space<vmem>>, vector<8x4xf32>
    %c0_5 = arith.constant 0 : index
    %c0_6 = arith.constant 0 : index
    %4 = vector.load %arg7[%c0_5, %c0_6] : memref<4x128xf32, #tpu.memory_space<vmem>>, vector<4x128xf32>
    %cst_7 = arith.constant dense<0.000000e+00> : vector<8x128xf32>
    %5 = tpu.matmul %3, %4, %cst_7 {dimension_numbers = #tpu.dot_dimension_numbers<[1], [0], [0], [1], [0, 0, 1, 1], [], []>} : vector<8x4xf32>, vector<4x128xf32>, vector<8x128xf32> -> vector<8x128xf32>
    %6 = arith.addf %2, %5 : vector<8x128xf32>
    %c0_8 = arith.constant 0 : index
    %c0_9 = arith.constant 0 : index
    %7 = vector.load %arg4[%c0_8, %c0_9] : memref<8x4xf32, #tpu.memory_space<vmem>>, vector<8x4xf32>
    %c0_10 = arith.constant 0 : index
    %c0_11 = arith.constant 0 : index
    %8 = vector.load %arg8[%c0_10, %c0_11] : memref<4x128xf32, #tpu.memory_space<vmem>>, vector<4x128xf32>
    %cst_12 = arith.constant dense<0.000000e+00> : vector<8x128xf32>
    %9 = tpu.matmul %7, %8, %cst_12 {dimension_numbers = #tpu.dot_dimension_numbers<[1], [0], [0], [1], [0, 0, 1, 1], [], []>} : vector<8x4xf32>, vector<4x128xf32>, vector<8x128xf32> -> vector<8x128xf32>
    %10 = arith.addf %6, %9 : vector<8x128xf32>
    %c0_13 = arith.constant 0 : index
    %c0_14 = arith.constant 0 : index
    %11 = vector.load %arg5[%c0_13, %c0_14] : memref<8x8xf32, #tpu.memory_space<vmem>>, vector<8x8xf32>
    %c0_15 = arith.constant 0 : index
    %c0_16 = arith.constant 0 : index
    %12 = vector.load %arg9[%c0_15, %c0_16] : memref<8x128xf32, #tpu.memory_space<vmem>>, vector<8x128xf32>
    %cst_17 = arith.constant dense<0.000000e+00> : vector<8x128xf32>
    %13 = tpu.matmul %11, %12, %cst_17 {dimension_numbers = #tpu.dot_dimension_numbers<[1], [0], [0], [1], [0, 0, 1, 1], [], []>} : vector<8x8xf32>, vector<8x128xf32>, vector<8x128xf32> -> vector<8x128xf32>
    %14 = arith.addf %10, %13 : vector<8x128xf32>
    %c0_18 = arith.constant 0 : index
    %c0_19 = arith.constant 0 : index
    %15 = vector.load %arg10[%c0_18, %c0_19] : memref<1x128xf32, #tpu.memory_space<vmem>>, vector<1x128xf32>
    %16 = vector.broadcast %15 : vector<1x128xf32> to vector<8x128xf32>
    %17 = arith.addf %14, %16 : vector<8x128xf32>
    %c0_20 = arith.constant 0 : index
    %c0_21 = arith.constant 0 : index
    %18 = vector.load %arg11[%c0_20, %c0_21] : memref<8x128xf32, #tpu.memory_space<vmem>>, vector<8x128xf32>
    tpu.vector_store %arg11[%c0_20, %c0_21], %17 {strides = array<i32>} : memref<8x128xf32, #tpu.memory_space<vmem>>, vector<8x128xf32>,
    return
  }
  func.func @transform_0(%arg0: i32, %arg1: i32) -> (i32, i32) {
    %c0_i32 = arith.constant 0 : i32
    %c0_i32_0 = arith.constant 0 : i32
    return %arg0, %c0_i32 : i32, i32
  }
  func.func @transform_1(%arg0: i32, %arg1: i32) -> (i32, i32) {
    %c0_i32 = arith.constant 0 : i32
    %c0_i32_0 = arith.constant 0 : i32
    return %arg0, %c0_i32 : i32, i32
  }
  func.func @transform_2(%arg0: i32, %arg1: i32) -> (i32, i32) {
    %c0_i32 = arith.constant 0 : i32
    %c0_i32_0 = arith.constant 0 : i32
    return %arg0, %c0_i32 : i32, i32
  }
  func.func @transform_3(%arg0: i32, %arg1: i32) -> (i32, i32) {
    %c0_i32 = arith.constant 0 : i32
    %c0_i32_0 = arith.constant 0 : i32
    return %arg0, %c0_i32 : i32, i32
  }
  func.func @transform_4(%arg0: i32, %arg1: i32) -> (i32, i32) {
    %c0_i32 = arith.constant 0 : i32
    %c0_i32_0 = arith.constant 0 : i32
    return %c0_i32, %arg1 : i32, i32
  }
  func.func @transform_5(%arg0: i32, %arg1: i32) -> (i32, i32) {
    %c0_i32 = arith.constant 0 : i32
    %c0_i32_0 = arith.constant 0 : i32
    return %c0_i32, %arg1 : i32, i32
  }
  func.func @transform_6(%arg0: i32, %arg1: i32) -> (i32, i32) {
    %c0_i32 = arith.constant 0 : i32
    %c0_i32_0 = arith.constant 0 : i32
    return %c0_i32, %arg1 : i32, i32
  }
  func.func @transform_7(%arg0: i32, %arg1: i32) -> (i32, i32) {
    %c0_i32 = arith.constant 0 : i32
    %c0_i32_0 = arith.constant 0 : i32
    return %c0_i32, %arg1 : i32, i32
  }
  func.func @transform_8(%arg0: i32, %arg1: i32) -> (i32, i32) {
    %c0_i32 = arith.constant 0 : i32
    %c0_i32_0 = arith.constant 0 : i32
    return %c0_i32, %arg1 : i32, i32
  }
  func.func @transform_9(%arg0: i32, %arg1: i32) -> (i32, i32) {
    %c0_i32 = arith.constant 0 : i32
    return %arg0, %arg1 : i32, i32
  }
}

</mosaic_0001>

<bundles_post_ra>
// kernel: tpu_custom_call.1
= control target key start
LH: loop header
LB: loop body
LE: loop exit
PB: predicated region body
PF: predicated region fallthrough
CT: control target
= control target key end

     0   :  { %14 = vsyncpa [#allocation3], 0  ;;  %s588_s0 = inlined_call_operand.vmem [shape: f32[8,16], index: 0, kind: input, shape index: {}]   ;;  %s589_s1 = inlined_call_operand.vmem [shape: f32[8,4], index: 1, kind: input, shape index: {}]   ;;  %s590_s2 = inlined_call_operand.vmem [shape: f32[8,4], index: 2, kind: input, shape index: {}]   ;;  %s591_s3 = inlined_call_operand.vmem [shape: f32[8,8], index: 3, kind: input, shape index: {}]   ;;  %s592_s4 = inlined_call_operand.vmem [shape: f32[16,128], index: 4, kind: input, shape index: {}]   ;;  %s593_s5 = inlined_call_operand.hbm [shape: f32[4,128], index: 5, kind: input, shape index: {}]   ;;  %s594_s6 = inlined_call_operand.vmem [shape: f32[4,128], index: 6, kind: input, shape index: {}]   ;;  %s595_s7 = inlined_call_operand.vmem [shape: f32[8,128], index: 7, kind: input, shape index: {}]   ;;  %s596_s8 = inlined_call_operand.vmem [shape: f32[1,128], index: 8, kind: input, shape index: {}]   ;;  %s597_s9 = inlined_call_operand.hbm [shape: f32[8,128], index: 9, kind: output, shape index: {}]  }
   0x1   :  { %15 = vsyncpa [#allocation4], 0  ;;  %s476_s30 = smov [#allocation2]   ;;  %s428_s13 = scalar_lea.hbm %s593_s5, 64 }
   0x2   :  { %s32_s10 = sshll.u32 %s476_s30, 4  ;;  %p429_p0 = scmp.ne.s32.totalorder %s593_s5, %s428_s13  ;;  %s33_s10 = int_to_ptr.vmem [resolvable:$true] %s32_s10 }
   0x3   :  { %p432_p1 = scmp.lt.u32.totalorder %s428_s13, %s593_s5 }
   0x5   :  { %p434_p2 = pnand %p432_p1, %p429_p0 }
   0x7   :  { %437 = shalt.err (!%p434_p2)
}
   0x8   :  { %s438_s18 = scalar_lea.vmem %s33_s10, 64  ;;  %p443_p4 = scmp.lt.s32.totalorder %s33_s10, %s33_s10 }
   0x9   :  { %p439_p3 = scmp.ne.s32.totalorder %s33_s10, %s438_s18  ;;  %p444_p5 = scmp.lt.s32.totalorder %s438_s18, %s438_s18 }
   0xb   :  { %p445_p6 = por %p444_p5, %p443_p4 }
   0xd   :  { %p446_p7 = pnand %p445_p6, %p439_p3 }
   0xf   :  { %449 = shalt.err (!%p446_p7)
}
  0x10   :  { %35 = dma.hbm_to_vmem [thread:$0]  %s593_s5, 64, %s33_s10, [#allocation3]  }
  0x11   :  { %472 = dma.done.wait [#allocation3], 64  }
  0x12   :  { %473 = vsyncadd [#allocation3], 4294967232  ;;  %v477_v0 = vmov 0.0   ;;  %v478_v1 = vmov 0.0|0.0   ;;  %vm479_vm0 = vmmov 0   ;;  %vm54_vm1 = vcmask 1043456  }
  0x13   :  { %398 = vmatprep.subr.mxu0 %v477_v0  ;;  %420 = vmatprep.subr.bf16.mxu1 %v478_v1  ;;  %vm50_vm2 = vcmask 31744   ;;  %v49_v2 = vld [vmem:[#allocation2] sm:$0xf]  ;;  %v47_v4 = vld [vmem:[%s592_s4 + $0x8] sm:$0xff]  ;;  %vm128_vm3 = vcmask 130048   ;;  %vm283_vm4 = vcmask 64512  }
  0x14   :  { %400 = vmatprep.mubr.msk.f32.mxu0 %vm479_vm0, %v477_v0  ;;  %407 = vmatprep.mubr.msk.f32.mxu1 %vm479_vm0, %v477_v0  ;;  %v46_v3 = vld [vmem:[%s592_s4] sm:$0xff]  ;;  %s480_s11 = smov [#allocation5]  }
  0x15   :  { %399 = vmatpush3.msk.msra.mxu0 %vm54_vm1, %v49_v2  ;;  %v421_v5 = vpack.c.bf16 %v47_v4, %v46_v3  ;;  %v48_v6 = vld [vmem:[%s589_s1] sm:$0xff]  ;;  %s373_s12 = sshll.u32 %s480_s11, 4  ;;  %s374_s12 = int_to_ptr.vmem [resolvable:$true] %s373_s12 }
  0x16   :  { %v203_v7 = vld [vmem:[%s594_s6] sm:$0xf]  ;;  %401 = vmatmul.mubr.msk.f32.vlgmr.msra.gmra.mrb[0].mxu0 %vm50_vm2, %v48_v6  ;;  %410 = vmatprep.subr.mxu0 %v477_v0  ;;  %p455_p9 = scmp.lt.s32.totalorder %s374_s12, %s374_s12 }
  0x17   :  { %422 = vmatpush3.bf16.msra.mxu1 %v421_v5  ;;  %411 = vmatpush3.msk.msra.mxu0 %vm54_vm1, %v203_v7  ;;  %v45_v8 = vld [vmem:[%s588_s0] sm:$0xff] }
  0x18   :  { %v202_v9 = vld [vmem:[%s590_s2] sm:$0xff]  ;;  %415 = vmatprep.subr.mxu1 %v477_v0  ;;  %412 = vmatprep.mubr.msk.f32.mxu0 %vm479_vm0, %v477_v0 }
  0x19   :  { %v282_v10 = vld [vmem:[%s595_s7] sm:$0xff] }
  0x1a   :  { %408 = vmatmul.mubr.msk.f32.vlgmr.msra.gmra.mrb[0].mxu1 %vm128_vm3, %v45_v8  ;;  %413 = vmatmul.mubr.msk.f32.vlgmr.msra.gmra.mrb[2].mxu0 %vm50_vm2, %v202_v9  ;;  %v281_v11 = vld [vmem:[%s591_s3] sm:$0xff]  ;;  %s450_s3 = scalar_lea.vmem %s374_s12, 128 }
  0x1b   :  { %416 = vmatpush3.msra.mxu1 %v282_v10  ;;  %417 = vmatprep.mubr.msk.f32.mxu1 %vm479_vm0, %v477_v0  ;;  %v388_v21 = vld [vmem:[%s596_s8] ss:$0 sm:$0xff]  ;;  %p451_p8 = scmp.ne.s32.totalorder %s374_s12, %s450_s3  ;;  %p456_p10 = scmp.lt.s32.totalorder %s450_s3, %s450_s3 }
  0x1d   :  { %p457_p11 = por %p456_p10, %p455_p9 }
  0x1e   :  { %418 = vmatmul.mubr.msk.f32.vlgmr.msra.gmra.mrb[2].mxu1 %vm283_vm4, %v281_v11 }
  0x1f   :  { %p458_p12 = pnand %p457_p11, %p451_p8 }
  0xe9   :  { %v124_v12 = vpop.f32.mrb[0].mxu0 }
  0xea   :  { %v402_v13 = vpop.f32.mrb[1].mxu0 }
  0xed   :  { %v198_v14 = vpop.f32.mrb[0].mxu1  ;;  %v276_v15 = vpop.f32.mrb[2].mxu0 }
  0xee   :  { %v199_v16 = vadd.f32 %v198_v14, %v124_v12  ;;  %v409_v17 = vpop.f32.mrb[1].mxu1  ;;  %v414_v18 = vpop.f32.mrb[3].mxu0 }
  0xf0   :  { %v280_v19 = vadd.f32 %v276_v15, %v199_v16 }
  0xf1   :  { %v353_v20 = vpop.f32.mrb[2].mxu1 }
  0xf2   :  { %v357_v22 = vadd.f32 %v353_v20, %v280_v19  ;;  %v419_v23 = vpop.f32.mrb[3].mxu1 }
  0xf4   :  { %v365_v24 = vadd.f32 %v388_v21, %v357_v22 }
  0xf6   :  { %366 = vst [vmem:[#allocation5] sm:$0xff] %v365_v24 }
  0xf7   :  { %461 = shalt.err (!%p458_p12)
}
  0xf8   :  { %s462_s15 = scalar_lea.hbm %s597_s9, 128 }
  0xf9   :  { %p463_p13 = scmp.ne.s32.totalorder %s597_s9, %s462_s15  ;;  %p466_p0 = scmp.lt.u32.totalorder %s462_s15, %s597_s9 }
  0xfb   :  { %p468_p1 = pnand %p466_p0, %p463_p13 }
  0xfd   :  { %471 = shalt.err (!%p468_p1)
}
  0xfe   :  { %376 = dma.vmem_to_hbm [thread:$0]  %s374_s12, 128, %s597_s9, [#allocation4]  }
  0xff   :  { %474 = dma.done.wait [#allocation4], 128  }
 0x100   :  { %475 = vsyncadd [#allocation4], 4294967168 }
 0x101   :  { %380 = vsyncpa [#allocation3], 1 }
 0x102   :  { %381 = vsyncpa [#allocation4], 1 }

</bundles_post_ra>
